<compile_context>
chip_gen: v5e
topology: v5e:2x2
jax: 0.10.0
libtpu: 0.0.40
codegen_flags: <defaults>
</compile_context>

<pallas_src>
import math
from functools import partial

import jax
import jax.numpy as jnp
from jax.experimental import pallas as pl
from jax.experimental.pallas import tpu as pltpu

INPUT_DIM = 64
LATENT_DIM = 32
HIDDEN_DIM = 128
LANE = 128          # vreg lane width: pad narrow feature dims to this
BATCH = 16


def autoencoder_kernel(x_ref, w_ref, b_ref, out_ref):
    """x_ref: (B,128) zero-padded input; w_ref: (4,128,128) packed weights;
    b_ref: (8,128) packed biases (rows 0-3 used); out_ref: (B,256) merged output."""
    x = x_ref[...]                                                     # (B, 128)

    # encoder: Linear(input_dim,128) -> ReLU -> Linear(128, latent[padded to 128])
    h1 = jnp.dot(x, w_ref[0], preferred_element_type=jnp.float32) + b_ref[0:1, :]
    h1 = jnp.maximum(h1, 0.0)
    z = jnp.dot(h1, w_ref[1], preferred_element_type=jnp.float32) + b_ref[1:2, :]
    out_ref[:, 0:LANE] = z                      # lane-dense unmasked store

    # decoder: Linear(latent,128) -> ReLU -> Linear(128, input_dim[padded to 128])
    h2 = jnp.dot(z, w_ref[2], preferred_element_type=jnp.float32) + b_ref[2:3, :]
    h2 = jnp.maximum(h2, 0.0)
    recon = jnp.dot(h2, w_ref[3], preferred_element_type=jnp.float32) + b_ref[3:4, :]
    out_ref[:, LANE:2 * LANE] = recon           # lane-dense unmasked store


def _pad_to(a, rows, cols):
    return jnp.pad(a, ((0, rows - a.shape[0]), (0, cols - a.shape[1])))


def pack_params(params):
    """One-time param prep: pad every weight to (128,128) and pack.

    Zero-padding is exact: padded w2 columns / b2 lanes are 0 so padded latent
    lanes are 0; padded w3 rows are 0 so they contribute nothing; padded recon
    lanes are sliced off in the wrapper.
    """
    (w1, b1), (w2, b2), (w3, b3), (w4, b4) = params
    w_packed = jnp.stack([
        _pad_to(w1, LANE, LANE),   # (64,128)  -> (128,128), zero rows match zero x pad
        _pad_to(w2, LANE, LANE),   # (128,32)  -> (128,128)
        _pad_to(w3, LANE, LANE),   # (32,128)  -> (128,128)
        _pad_to(w4, LANE, LANE),   # (128,64)  -> (128,128)
    ], axis=0)                                             # (4,128,128)
    b_packed = jnp.zeros((8, LANE), jnp.float32)
    b_packed = b_packed.at[0, :].set(_pad_to(b1, 1, LANE)[0])
    b_packed = b_packed.at[1, :].set(_pad_to(b2, 1, LANE)[0])
    b_packed = b_packed.at[2, :].set(_pad_to(b3, 1, LANE)[0])
    b_packed = b_packed.at[3, :].set(_pad_to(b4, 1, LANE)[0])   # (8,128), rows 4-7 zero
    return w_packed, b_packed


@jax.jit
def autoencoder_forward(x, packed_params):
    """x: (B, INPUT_DIM) float32. Returns (latent (B, LATENT_DIM), recon (B, INPUT_DIM))."""
    B, D = x.shape
    assert D == INPUT_DIM and B % 8 == 0
    w_packed, b_packed = packed_params

    x_pad = jnp.pad(x, ((0, 0), (0, LANE - INPUT_DIM)))    # fused into the jit

    vmem = partial(pl.BlockSpec, memory_space=pltpu.MemorySpace.VMEM)
    out = pl.pallas_call(
        autoencoder_kernel,
        out_shape=jax.ShapeDtypeStruct((B, 2 * LANE), jnp.float32),
        in_specs=[vmem(), vmem(), vmem()],
        out_specs=vmem(),
    )(x_pad, w_packed, b_packed)

    latent = out[:, :LATENT_DIM]
    recon = out[:, LANE:LANE + INPUT_DIM]
    return latent, recon


def init_linear(key, in_features, out_features):
    """Init matching nn.Linear's uniform(-1/sqrt(in), 1/sqrt(in)).

    Weight returned pre-transposed as (in, out); bias as (1, out).
    """
    kw, kb = jax.random.split(key)
    bound = 1.0 / math.sqrt(in_features)
    w = jax.random.uniform(kw, (in_features, out_features), jnp.float32, -bound, bound)
    b = jax.random.uniform(kb, (1, out_features), jnp.float32, -bound, bound)
    return w, b


def make_params(key):
    k1, k2, k3, k4 = jax.random.split(key, 4)
    return (
        init_linear(k1, INPUT_DIM, HIDDEN_DIM),   # encoder.0
        init_linear(k2, HIDDEN_DIM, LATENT_DIM),  # encoder.2
        init_linear(k3, LATENT_DIM, HIDDEN_DIM),  # decoder.0
        init_linear(k4, HIDDEN_DIM, INPUT_DIM),   # decoder.2
    )


def reference_forward(x, params):
    (w1, b1), (w2, b2), (w3, b3), (w4, b4) = params
    h1 = jnp.maximum(x @ w1 + b1, 0.0)
    z = h1 @ w2 + b2
    h2 = jnp.maximum(z @ w3 + b3, 0.0)
    recon = h2 @ w4 + b4
    return z, recon


if __name__ == "__main__":
    key = jax.random.PRNGKey(0)
    kx, kp = jax.random.split(key)
    x = jax.random.normal(kx, (BATCH, INPUT_DIM), jnp.float32)
    params = make_params(kp)
    packed = pack_params(params)          # one-time prep, outside the per-call path

    latent, recon = autoencoder_forward(x, packed)
    jax.block_until_ready((latent, recon))

    # sanity check against a pure-JAX reference
    latent_ref, recon_ref = reference_forward(x, params)
    assert latent.shape == (BATCH, LATENT_DIM)
    assert recon.shape == (BATCH, INPUT_DIM)
    assert jnp.allclose(latent, latent_ref, atol=1e-5, rtol=1e-5)
    assert jnp.allclose(recon, recon_ref, atol=1e-5, rtol=1e-5)

    print("KERNEL_OK")
</pallas_src>

<mosaic_0001>
module attributes {stable_mosaic.version = 11 : i64} {
  func.func @autoencoder_kernel(%arg0: memref<16x128xf32, #tpu.memory_space<vmem>>, %arg1: memref<4x128x128xf32, #tpu.memory_space<vmem>>, %arg2: memref<8x128xf32, #tpu.memory_space<vmem>>, %arg3: memref<16x256xf32, #tpu.memory_space<vmem>>) attributes {dimension_semantics = [], scalar_prefetch = 0 : i64, scratch_operands = 0 : i64, tpu.core_type = #tpu.core_type<tc>} {
    %c0 = arith.constant 0 : index
    %c0_0 = arith.constant 0 : index
    %0 = vector.load %arg0[%c0, %c0_0] : memref<16x128xf32, #tpu.memory_space<vmem>>, vector<16x128xf32>
    %c0_1 = arith.constant 0 : index
    %c0_2 = arith.constant 0 : index
    %c0_3 = arith.constant 0 : index
    %1 = vector.load %arg1[%c0_1, %c0_2, %c0_3] : memref<4x128x128xf32, #tpu.memory_space<vmem>>, vector<1x128x128xf32>
    %2 = vector.shape_cast %1 : vector<1x128x128xf32> to vector<128x128xf32>
    %cst = arith.constant dense<0.000000e+00> : vector<16x128xf32>
    %3 = tpu.matmul %0, %2, %cst {dimension_numbers = #tpu.dot_dimension_numbers<[1], [0], [0], [1], [0, 0, 1, 1], [], []>} : vector<16x128xf32>, vector<128x128xf32>, vector<16x128xf32> -> vector<16x128xf32>
    %c0_4 = arith.constant 0 : index
    %c0_5 = arith.constant 0 : index
    %4 = vector.load %arg2[%c0_4, %c0_5] : memref<8x128xf32, #tpu.memory_space<vmem>>, vector<1x128xf32>
    %5 = vector.broadcast %4 : vector<1x128xf32> to vector<16x128xf32>
    %6 = arith.addf %3, %5 : vector<16x128xf32>
    %cst_6 = arith.constant 0.000000e+00 : f32
    %7 = vector.broadcast %cst_6 : f32 to vector<16x128xf32>
    %8 = arith.maximumf %6, %7 : vector<16x128xf32>
    %c1 = arith.constant 1 : index
    %c0_7 = arith.constant 0 : index
    %c0_8 = arith.constant 0 : index
    %9 = vector.load %arg1[%c1, %c0_7, %c0_8] : memref<4x128x128xf32, #tpu.memory_space<vmem>>, vector<1x128x128xf32>
    %10 = vector.shape_cast %9 : vector<1x128x128xf32> to vector<128x128xf32>
    %cst_9 = arith.constant dense<0.000000e+00> : vector<16x128xf32>
    %11 = tpu.matmul %8, %10, %cst_9 {dimension_numbers = #tpu.dot_dimension_numbers<[1], [0], [0], [1], [0, 0, 1, 1], [], []>} : vector<16x128xf32>, vector<128x128xf32>, vector<16x128xf32> -> vector<16x128xf32>
    %c1_10 = arith.constant 1 : index
    %c0_11 = arith.constant 0 : index
    %12 = vector.load %arg2[%c1_10, %c0_11] : memref<8x128xf32, #tpu.memory_space<vmem>>, vector<1x128xf32>
    %13 = vector.broadcast %12 : vector<1x128xf32> to vector<16x128xf32>
    %14 = arith.addf %11, %13 : vector<16x128xf32>
    %c0_12 = arith.constant 0 : index
    %c0_13 = arith.constant 0 : index
    %15 = vector.load %arg3[%c0_12, %c0_13] : memref<16x256xf32, #tpu.memory_space<vmem>>, vector<16x128xf32>
    tpu.vector_store %arg3[%c0_12, %c0_13], %14 {strides = array<i32>} : memref<16x256xf32, #tpu.memory_space<vmem>>, vector<16x128xf32>,
    %c2 = arith.constant 2 : index
    %c0_14 = arith.constant 0 : index
    %c0_15 = arith.constant 0 : index
    %16 = vector.load %arg1[%c2, %c0_14, %c0_15] : memref<4x128x128xf32, #tpu.memory_space<vmem>>, vector<1x128x128xf32>
    %17 = vector.shape_cast %16 : vector<1x128x128xf32> to vector<128x128xf32>
    %cst_16 = arith.constant dense<0.000000e+00> : vector<16x128xf32>
    %18 = tpu.matmul %14, %17, %cst_16 {dimension_numbers = #tpu.dot_dimension_numbers<[1], [0], [0], [1], [0, 0, 1, 1], [], []>} : vector<16x128xf32>, vector<128x128xf32>, vector<16x128xf32> -> vector<16x128xf32>
    %c2_17 = arith.constant 2 : index
    %c0_18 = arith.constant 0 : index
    %19 = vector.load %arg2[%c2_17, %c0_18] : memref<8x128xf32, #tpu.memory_space<vmem>>, vector<1x128xf32>
    %20 = vector.broadcast %19 : vector<1x128xf32> to vector<16x128xf32>
    %21 = arith.addf %18, %20 : vector<16x128xf32>
    %cst_19 = arith.constant 0.000000e+00 : f32
    %22 = vector.broadcast %cst_19 : f32 to vector<16x128xf32>
    %23 = arith.maximumf %21, %22 : vector<16x128xf32>
    %c3 = arith.constant 3 : index
    %c0_20 = arith.constant 0 : index
    %c0_21 = arith.constant 0 : index
    %24 = vector.load %arg1[%c3, %c0_20, %c0_21] : memref<4x128x128xf32, #tpu.memory_space<vmem>>, vector<1x128x128xf32>
    %25 = vector.shape_cast %24 : vector<1x128x128xf32> to vector<128x128xf32>
    %cst_22 = arith.constant dense<0.000000e+00> : vector<16x128xf32>
    %26 = tpu.matmul %23, %25, %cst_22 {dimension_numbers = #tpu.dot_dimension_numbers<[1], [0], [0], [1], [0, 0, 1, 1], [], []>} : vector<16x128xf32>, vector<128x128xf32>, vector<16x128xf32> -> vector<16x128xf32>
    %c3_23 = arith.constant 3 : index
    %c0_24 = arith.constant 0 : index
    %27 = vector.load %arg2[%c3_23, %c0_24] : memref<8x128xf32, #tpu.memory_space<vmem>>, vector<1x128xf32>
    %28 = vector.broadcast %27 : vector<1x128xf32> to vector<16x128xf32>
    %29 = arith.addf %26, %28 : vector<16x128xf32>
    %c0_25 = arith.constant 0 : index
    %c128 = arith.constant 128 : index
    %30 = vector.load %arg3[%c0_25, %c128] : memref<16x256xf32, #tpu.memory_space<vmem>>, vector<16x128xf32>
    tpu.vector_store %arg3[%c0_25, %c128], %29 {strides = array<i32>} : memref<16x256xf32, #tpu.memory_space<vmem>>, vector<16x128xf32>,
    return
  }
}

</mosaic_0001>

<bundles_post_ra>
// kernel: autoencoder_forward.1
= control target key start
LH: loop header
LB: loop body
LE: loop exit
PB: predicated region body
PF: predicated region fallthrough
CT: control target
= control target key end

     0   :  { %8 = vsyncpa [#allocation3], 0  ;;  %s245_s15 = smov [#allocation2]   ;;  %s246_s17 = smov 128   ;;  %s301_s0 = inlined_call_operand.vmem [shape: f32[16,128], index: 0, kind: input, shape index: {}]   ;;  %s302_s1 = inlined_call_operand.hbm [shape: f32[4,128,128], index: 1, kind: input, shape index: {}]   ;;  %s303_s2 = inlined_call_operand.vmem [shape: f32[8,128], index: 2, kind: input, shape index: {}]   ;;  %s304_s3 = inlined_call_operand.vmem [shape: f32[16,256], index: 3, kind: output, shape index: {}]  }
   0x1   :  { %s15_s14 = sshll.u32 %s302_s1, 4  ;;  %s17_s16 = sshll.u32 %s245_s15, 4  ;;  %s16_s14 = int_to_ptr.hbm [resolvable:$true] %s15_s14  ;;  %s18_s16 = int_to_ptr.vmem [resolvable:$true] %s17_s16 }
   0x2   :  { %s247_s18 = smov 8  }
   0x3   :  { %23 = dma.hbm_to_vmem [thread:$0]  %s16_s14, 8192, %s18_s16, [#allocation3], %s246_s17, %s246_s17, %s247_s18  }
   0x4   :  { %243 = dma.done.wait [#allocation3], 8192  }
   0x5   :  { %244 = vsyncadd [#allocation3], 4294959104  ;;  %v47_v0 = vld [vmem:[#allocation2 + $0x78] sm:$0xff]  ;;  %v46_v1 = vld [vmem:[#allocation2 + $0x70] sm:$0xff] }
   0x6   :  { %50 = vmatpush.msra.mxu0 %v47_v0  ;;  %v45_v2 = vld [vmem:[#allocation2 + $0x68] sm:$0xff]  ;;  %v44_v3 = vld [vmem:[#allocation2 + $0x60] sm:$0xff]  ;;  %v43_v4 = vld [vmem:[#allocation2 + $0x58] sm:$0xff] }
   0x7   :  { %v42_v5 = vld [vmem:[#allocation2 + $0x50] sm:$0xff]  ;;  %v91_v6 = vld [vmem:[#allocation2 + $0xf8] sm:$0xff]  ;;  %v41_v8 = vld [vmem:[#allocation2 + $0x48] sm:$0xff] }
   0x8   :  { %51 = vmatpush.msra.mxu0 %v46_v1  ;;  %v90_v7 = vld [vmem:[#allocation2 + $0xf0] sm:$0xff]  ;;  %94 = vmatpush.msra.mxu1 %v91_v6  ;;  %v89_v9 = vld [vmem:[#allocation2 + $0xe8] sm:$0xff]  ;;  %v40_v10 = vld [vmem:[#allocation2 + $0x40] sm:$0xff] }
   0x9   :  { %v88_v11 = vld [vmem:[#allocation2 + $0xe0] sm:$0xff]  ;;  %v39_v12 = vld [vmem:[#allocation2 + $0x38] sm:$0xff]  ;;  %v38_v14 = vld [vmem:[#allocation2 + $0x30] sm:$0xff] }
   0xa   :  { %52 = vmatpush.msra.mxu0 %v45_v2  ;;  %95 = vmatpush.msra.mxu1 %v90_v7  ;;  %v87_v13 = vld [vmem:[#allocation2 + $0xd8] sm:$0xff]  ;;  %v86_v15 = vld [vmem:[#allocation2 + $0xd0] sm:$0xff]  ;;  %v37_v16 = vld [vmem:[#allocation2 + $0x28] sm:$0xff] }
   0xb   :  { %v85_v17 = vld [vmem:[#allocation2 + $0xc8] sm:$0xff]  ;;  %v36_v18 = vld [vmem:[#allocation2 + $0x20] sm:$0xff]  ;;  %v35_v20 = vld [vmem:[#allocation2 + $0x18] sm:$0xff] }
   0xc   :  { %53 = vmatpush.msra.mxu0 %v44_v3  ;;  %96 = vmatpush.msra.mxu1 %v89_v9  ;;  %v84_v19 = vld [vmem:[#allocation2 + $0xc0] sm:$0xff]  ;;  %v83_v21 = vld [vmem:[#allocation2 + $0xb8] sm:$0xff]  ;;  %v34_v22 = vld [vmem:[#allocation2 + $0x10] sm:$0xff] }
   0xd   :  { %v82_v23 = vld [vmem:[#allocation2 + $0xb0] sm:$0xff]  ;;  %v33_v24 = vld [vmem:[#allocation2 + $0x8] sm:$0xff]  ;;  %v32_v26 = vld [vmem:[#allocation2] sm:$0xff] }
   0xe   :  { %54 = vmatpush.msra.mxu0 %v43_v4  ;;  %97 = vmatpush.msra.mxu1 %v88_v11  ;;  %v81_v25 = vld [vmem:[#allocation2 + $0xa8] sm:$0xff]  ;;  %v80_v27 = vld [vmem:[#allocation2 + $0xa0] sm:$0xff]  ;;  %v79_v29 = vld [vmem:[#allocation2 + $0x98] sm:$0xff] }
   0xf   :  { %v30_v28 = vld [vmem:[%s301_s0] sm:$0xff]  ;;  %v31_v30 = vld [vmem:[%s301_s0 + $0x8] sm:$0xff]  ;;  %v78_v31 = vld [vmem:[#allocation2 + $0x90] sm:$0xff] }
  0x10   :  { %55 = vmatpush.msra.mxu0 %v42_v5  ;;  %98 = vmatpush.msra.mxu1 %v87_v13  ;;  %v77_v32 = vld [vmem:[#allocation2 + $0x88] sm:$0xff]  ;;  %v76_v33 = vld [vmem:[#allocation2 + $0x80] sm:$0xff]  ;;  %v135_v34 = vld [vmem:[#allocation2 + $0x178] sm:$0xff] }
  0x11   :  { %v134_v35 = vld [vmem:[#allocation2 + $0x170] sm:$0xff]  ;;  %138 = vmatpush.msra.mxu2 %v135_v34  ;;  %v133_v36 = vld [vmem:[#allocation2 + $0x168] sm:$0xff]  ;;  %v132_v37 = vld [vmem:[#allocation2 + $0x160] sm:$0xff] }
  0x12   :  { %56 = vmatpush.msra.mxu0 %v41_v8  ;;  %99 = vmatpush.msra.mxu1 %v86_v15  ;;  %v131_v38 = vld [vmem:[#allocation2 + $0x158] sm:$0xff]  ;;  %v130_v39 = vld [vmem:[#allocation2 + $0x150] sm:$0xff]  ;;  %v129_v40 = vld [vmem:[#allocation2 + $0x148] sm:$0xff] }
  0x13   :  { %139 = vmatpush.msra.mxu2 %v134_v35  ;;  %v128_v41 = vld [vmem:[#allocation2 + $0x140] sm:$0xff]  ;;  %v127_v42 = vld [vmem:[#allocation2 + $0x138] sm:$0xff]  ;;  %v126_v44 = vld [vmem:[#allocation2 + $0x130] sm:$0xff] }
  0x14   :  { %57 = vmatpush.msra.mxu0 %v40_v10  ;;  %100 = vmatpush.msra.mxu1 %v85_v17  ;;  %v215_v43 = vld [vmem:[%s303_s2] ss:$0 sm:$0xff]  ;;  %v125_v45 = vld [vmem:[#allocation2 + $0x128] sm:$0xff]  ;;  %v123_v50 = vld [vmem:[#allocation2 + $0x118] sm:$0xff] }
  0x15   :  { %140 = vmatpush.msra.mxu2 %v133_v36  ;;  %v124_v48 = vld [vmem:[#allocation2 + $0x120] sm:$0xff]  ;;  %v122_v51 = vld [vmem:[#allocation2 + $0x110] sm:$0xff]  ;;  %v121_v55 = vld [vmem:[#allocation2 + $0x108] sm:$0xff] }
  0x16   :  { %58 = vmatpush.msra.mxu0 %v39_v12  ;;  %101 = vmatpush.msra.mxu1 %v84_v19  ;;  %v120_v56 = vld [vmem:[#allocation2 + $0x100] sm:$0xff]  ;;  %v179_v57 = vld [vmem:[#allocation2 + $0x1f8] sm:$0xff]  ;;  %v178_v58 = vld [vmem:[#allocation2 + $0x1f0] sm:$0xff] }
  0x17   :  { %141 = vmatpush.msra.mxu2 %v132_v37  ;;  %182 = vmatpush.msra.mxu3 %v179_v57  ;;  %v177_v59 = vld [vmem:[#allocation2 + $0x1e8] sm:$0xff]  ;;  %v176_v60 = vld [vmem:[#allocation2 + $0x1e0] sm:$0xff]  ;;  %v175_v61 = vld [vmem:[#allocation2 + $0x1d8] sm:$0xff] }
  0x18   :  { %59 = vmatpush.msra.mxu0 %v38_v14  ;;  %102 = vmatpush.msra.mxu1 %v83_v21  ;;  %v174_v62 = vld [vmem:[#allocation2 + $0x1d0] sm:$0xff]  ;;  %v173_v63 = vld [vmem:[#allocation2 + $0x1c8] sm:$0xff]  ;;  %v172_v0 = vld [vmem:[#allocation2 + $0x1c0] sm:$0xff] }
  0x19   :  { %142 = vmatpush.msra.mxu2 %v131_v38  ;;  %183 = vmatpush.msra.mxu3 %v178_v58  ;;  %v171_v1 = vld [vmem:[#allocation2 + $0x1b8] sm:$0xff]  ;;  %v170_v2 = vld [vmem:[#allocation2 + $0x1b0] sm:$0xff]  ;;  %v216_v3 = vld [vmem:[%s303_s2 + $0x1] ss:$0 sm:$0xff] }
  0x1a   :  { %60 = vmatpush.msra.mxu0 %v37_v16  ;;  %103 = vmatpush.msra.mxu1 %v82_v23  ;;  %v169_v4 = vld [vmem:[#allocation2 + $0x1a8] sm:$0xff]  ;;  %v168_v5 = vld [vmem:[#allocation2 + $0x1a0] sm:$0xff]  ;;  %v167_v8 = vld [vmem:[#allocation2 + $0x198] sm:$0xff] }
  0x1b   :  { %143 = vmatpush.msra.mxu2 %v130_v39  ;;  %184 = vmatpush.msra.mxu3 %v177_v59  ;;  %v166_v11 = vld [vmem:[#allocation2 + $0x190] sm:$0xff]  ;;  %v165_v12 = vld [vmem:[#allocation2 + $0x188] sm:$0xff]  ;;  %v164_v13 = vld [vmem:[#allocation2 + $0x180] sm:$0xff] }
  0x1c   :  { %61 = vmatpush.msra.mxu0 %v36_v18  ;;  %104 = vmatpush.msra.mxu1 %v81_v25  ;;  %v217_v14 = vld [vmem:[%s303_s2 + $0x2] ss:$0 sm:$0xff]  ;;  %v218_v21 = vld [vmem:[%s303_s2 + $0x3] ss:$0 sm:$0xff] }
  0x1d   :  { %144 = vmatpush.msra.mxu2 %v129_v40  ;;  %185 = vmatpush.msra.mxu3 %v176_v60 }
  0x1e   :  { %62 = vmatpush.msra.mxu0 %v35_v20  ;;  %105 = vmatpush.msra.mxu1 %v80_v27 }
  0x1f   :  { %145 = vmatpush.msra.mxu2 %v128_v41  ;;  %186 = vmatpush.msra.mxu3 %v175_v61 }
  0x20   :  { %63 = vmatpush.msra.mxu0 %v34_v22  ;;  %106 = vmatpush.msra.mxu1 %v79_v29 }
  0x21   :  { %146 = vmatpush.msra.mxu2 %v127_v42  ;;  %187 = vmatpush.msra.mxu3 %v174_v62 }
  0x22   :  { %64 = vmatpush.msra.mxu0 %v33_v24  ;;  %107 = vmatpush.msra.mxu1 %v78_v31 }
  0x23   :  { %147 = vmatpush.msra.mxu2 %v126_v44  ;;  %188 = vmatpush.msra.mxu3 %v173_v63 }
  0x24   :  { %65 = vmatpush.msra.mxu0 %v32_v26  ;;  %108 = vmatpush.msra.mxu1 %v77_v32 }
  0x25   :  { %66 = vmatmul.f32.vlgmr.msra.gmra.mxu0 %v30_v28  ;;  %148 = vmatpush.msra.mxu2 %v125_v45 }
  0x26   :  { %109 = vmatpush.msra.mxu1 %v76_v33  ;;  %189 = vmatpush.msra.mxu3 %v172_v0 }
  0x27   :  { %149 = vmatpush.msra.mxu2 %v124_v48 }
  0x28   :  { %190 = vmatpush.msra.mxu3 %v171_v1 }
  0x29   :  { %150 = vmatpush.msra.mxu2 %v123_v50 }
  0x2a   :  { %191 = vmatpush.msra.mxu3 %v170_v2 }
  0x2b   :  { %151 = vmatpush.msra.mxu2 %v122_v51 }
  0x2c   :  { %192 = vmatpush.msra.mxu3 %v169_v4 }
  0x2d   :  { %69 = vmatmul.f32.gmra.mxu0 %v31_v30  ;;  %152 = vmatpush.msra.mxu2 %v121_v55 }
  0x2e   :  { %193 = vmatpush.msra.mxu3 %v168_v5 }
  0x2f   :  { %153 = vmatpush.msra.mxu2 %v120_v56 }
  0x30   :  { %194 = vmatpush.msra.mxu3 %v167_v8 }
  0x32   :  { %195 = vmatpush.msra.mxu3 %v166_v11 }
  0x34   :  { %196 = vmatpush.msra.mxu3 %v165_v12 }
  0x36   :  { %197 = vmatpush.msra.mxu3 %v164_v13 }
  0xa2   :  { %v67_v46 = vpop.f32.mrf.mxu0 }
  0xa3   :  { %v68_v47 = vadd.f32 %v215_v43, %v67_v46 }
  0xa5   :  { %v73_v49 = vmax.f32 %v68_v47, 0.0 }
  0xa7   :  { %110 = vmatmul.f32.vlgmr.msra.gmra.mxu1 %v73_v49 }
  0xaa   :  { %v70_v52 = vpop.f32.mrf.mxu0 }
  0xab   :  { %v71_v53 = vadd.f32 %v215_v43, %v70_v52 }
  0xad   :  { %v74_v54 = vmax.f32 %v71_v53, 0.0 }
  0xaf   :  { %113 = vmatmul.f32.gmra.mxu1 %v74_v54 }
 0x124   :  { %v111_v6 = vpop.f32.mrf.mxu1 }
 0x125   :  { %v112_v7 = vadd.f32 %v216_v3, %v111_v6 }
 0x127   :  { %117 = vst [vmem:[%s304_s3] sm:$0xff] %v112_v7  ;;  %154 = vmatmul.f32.vlgmr.msra.gmra.mxu2 %v112_v7 }
 0x12c   :  { %v114_v9 = vpop.f32.mrf.mxu1 }
 0x12d   :  { %v115_v10 = vadd.f32 %v216_v3, %v114_v9 }
 0x12f   :  { %118 = vst [vmem:[%s304_s3 + $0x10] sm:$0xff] %v115_v10  ;;  %157 = vmatmul.f32.gmra.mxu2 %v115_v10 }
 0x1aa   :  { %v155_v15 = vpop.f32.mrf.mxu2 }
 0x1ab   :  { %v156_v16 = vadd.f32 %v217_v14, %v155_v15 }
 0x1ad   :  { %v161_v17 = vmax.f32 %v156_v16, 0.0 }
 0x1af   :  { %198 = vmatmul.f32.vlgmr.msra.gmra.mxu3 %v161_v17 }
 0x1b2   :  { %v158_v18 = vpop.f32.mrf.mxu2 }
 0x1b3   :  { %v159_v19 = vadd.f32 %v217_v14, %v158_v18 }
 0x1b5   :  { %v162_v20 = vmax.f32 %v159_v19, 0.0 }
 0x1b7   :  { %201 = vmatmul.f32.gmra.mxu3 %v162_v20 }
 0x232   :  { %v199_v22 = vpop.f32.mrf.mxu3 }
 0x233   :  { %v200_v23 = vadd.f32 %v218_v21, %v199_v22 }
 0x235   :  { %205 = vst [vmem:[%s304_s3 + $0x8] sm:$0xff] %v200_v23 }
 0x23a   :  { %v202_v24 = vpop.f32.mrf.mxu3 }
 0x23b   :  { %v203_v25 = vadd.f32 %v218_v21, %v202_v24 }
 0x23d   :  { %206 = vst [vmem:[%s304_s3 + $0x18] sm:$0xff] %v203_v25 }
 0x23e   :  { %211 = vsyncpa [#allocation3], 1 }

</bundles_post_ra>
